<compile_context>
chip_gen: v7x
topology: tpu7x:2x2x1
jax: 0.10.0
libtpu: 0.0.40
codegen_flags: <defaults>
</compile_context>

<pallas_src>
import functools

import jax
import jax.numpy as jnp
from jax import lax
from jax.experimental import pallas as pl
from jax.experimental.pallas import tpu as pltpu

LANE = 128  # lane width; layer-2 output padded to this so stores are unmasked / lane-dense


def _gatnet_fused_kernel(n_id_ref,                # SMEM  [Ns1] int32  (scalar prefetch)
                         x_hbm,                   # HBM   [N_total, F_in] f32 (pl.ANY)
                         adj1_ref, adj2_ref,      # VMEM  int8 0/1 adjacencies
                         w1c_ref, b1_ref,         # VMEM  [F_in, 2*HC] bf16, [1, HC] f32
                         w2c_ref, b2_ref,         # VMEM  [HC, 2*LANE] bf16, [1, LANE] f32
                         out_ref,                 # VMEM  [Nd2, LANE] f32
                         xbuf, sem,               # scratch: VMEM [Ns1, F_in] f32, DMA sems (2,)
                         *, out_channels, n_src1):
    f32 = jnp.float32
    bf16 = jnp.bfloat16

    # ---------------- in-kernel gather: x_src = x[n_id]  (HBM -> VMEM, double-buffered) ----
    def row_dma(src_row, dst_row, slot):
        return pltpu.make_async_copy(x_hbm.at[pl.ds(src_row, 1), :],
                                     xbuf.at[pl.ds(dst_row, 1), :],
                                     sem.at[slot])

    row_dma(n_id_ref[0], 0, 0).start()

    @pl.loop(0, n_src1)
    def _(i):
        slot = lax.rem(i, 2)

        @pl.when(i + 1 < n_src1)
        def _():
            row_dma(n_id_ref[i + 1], i + 1, 1 - slot).start()

        row_dma(0, i, slot).wait()     # wait only needs the semaphore + transfer size

    xs_bf = xbuf[...].astype(bf16)                            # cast on-chip (VPU, under DMA)
    adj1_bf = adj1_ref[...].astype(f32).astype(bf16)          # int8 0/1 -> exact in bf16
    adj2_bf = adj2_ref[...].astype(f32).astype(bf16)

    def gat_layer(src_bf, adj_bf, wcat_bf, b_f32, hc):
        """One GATConv (source-only attention, dense 0/1 adjacency), all heads lane-dense."""
        # Single MXU pass: lanes [0, hc) = h = x@W ; lanes [hc, 2*hc) = alpha = x@(W@A).
        hcat = jnp.dot(src_bf, wcat_bf, preferred_element_type=f32)      # [Ns, 2*hc]
        h = hcat[:, :hc]
        alpha = hcat[:, hc:]
        s = jnp.where(alpha > 0, alpha, 0.2 * alpha)                     # LeakyReLU(0.2), f32
        # Softmax is shift-invariant: subtract the per-head max over ALL sources (>= any
        # per-destination masked max).  NOTE: at very large logit spreads a per-destination
        # or flash-style running max is preferable (documented correctness concern).
        s = s - jnp.max(s, axis=0, keepdims=True)
        e = jnp.exp(s)                                                   # f32, EUP
        # Fused aggregation: ONE adjacency pass produces numerator and denominator (256 lanes).
        comb = jnp.concatenate([(h * e).astype(bf16), e.astype(bf16)], axis=1)   # [Ns, 2*hc]
        agg = jnp.dot(adj_bf, comb, preferred_element_type=f32)          # [Nd, 2*hc]
        num = agg[:, :hc]
        den = agg[:, hc:]
        # approx reciprocal: ~1e-3 rel error, fine for inference; drop approx for parity tests.
        inv = pl.reciprocal(jnp.maximum(den, 1e-16), approx=True)        # isolated dst -> 0
        return num * inv + b_f32

    # ---- layer 1: GATConv(F_in, 16, heads=8) -> concat 128 feats, then ELU ----------------
    o1 = gat_layer(xs_bf, adj1_bf, w1c_ref[...], b1_ref[...], b1_ref.shape[1])
    h1 = jnp.where(o1 > 0, o1, jnp.exp(o1) - 1.0)                        # ELU
    # F.dropout(p=0.5, training=False) -> identity.

    # ---- layer 2: GATConv(128, out_channels, heads=1, concat=False), lane-padded ----------
    o2 = gat_layer(h1.astype(bf16), adj2_bf, w2c_ref[...], b2_ref[...], LANE)

    # log_softmax over the first `out_channels` (valid) lanes; padded lanes masked out.
    lane_idx = jax.lax.broadcasted_iota(jnp.int32, o2.shape, 1)
    valid = lane_idx < out_channels
    o2m = jnp.where(valid, o2, f32(-1e30))
    z = o2m - jnp.max(o2m, axis=1, keepdims=True)
    lse = jnp.log(jnp.sum(jnp.where(valid, jnp.exp(z), 0.0), axis=1, keepdims=True))
    out_ref[...] = (z - lse).astype(out_ref.dtype)                       # [Nd2, LANE] lane-dense


def prepare_params(params, *, heads, out_channels):
    """Once-per-parameter-set preprocessing (hoisted out of every forward): fold the
    block-diagonal attention matrices into the weights, lane-pad layer 2, cast to bf16."""
    f32 = jnp.float32
    hidden = params["w1"].shape[1]                   # = heads * per_head
    per_head = hidden // heads

    # Layer 1: A1[c, l] = att1_flat[c] if head(c) == head(l) else 0, so x @ (W1@A1) yields the
    # per-head logit broadcast across that head's lanes (lane-dense alpha).
    w1 = params["w1"].astype(f32)                                        # [F_in, HC]
    att1 = params["att1"].reshape(hidden).astype(f32)
    head_of = jnp.arange(hidden) // per_head
    same_head = (head_of[:, None] == head_of[None, :]).astype(f32)
    a1 = same_head * att1[:, None]                                       # [HC, HC] block-diag
    w1cat = jnp.concatenate([w1, w1 @ a1], axis=1).astype(jnp.bfloat16)  # [F_in, 2*HC]
    b1 = params["b1"].reshape(1, hidden).astype(f32)

    # Layer 2 (heads=1) padded to LANE lanes; W2pad@A2 is the single-head logit column
    # replicated on every lane.
    w2 = params["w2"].astype(f32)                                        # [HC, out]
    att2 = params["att2"].reshape(out_channels, 1).astype(f32)
    w2pad = jnp.zeros((hidden, LANE), f32).at[:, :out_channels].set(w2)
    wa2 = jnp.broadcast_to(w2 @ att2, (hidden, LANE))
    w2cat = jnp.concatenate([w2pad, wa2], axis=1).astype(jnp.bfloat16)   # [HC, 2*LANE]
    b2 = jnp.zeros((1, LANE), f32).at[:, :out_channels].set(
        params["b2"].reshape(1, -1).astype(f32))
    return {"w1cat": w1cat, "b1": b1, "w2cat": w2cat, "b2": b2, "hidden": hidden}


def gatnet_forward(prepped, x, data_flow, *, out_channels):
    """GATNet.forward: in-kernel gather -> fused [GATConv(8 heads)+ELU -> GATConv(1)+log_softmax]."""
    n_id, adj1, adj2 = data_flow
    n_id = n_id.astype(jnp.int32)
    # Adjacency transported as int8 0/1 (cast to bf16 on-chip); ideally stored as int8 upstream.
    adj1_i8 = adj1 if adj1.dtype == jnp.int8 else adj1.astype(jnp.int8)
    adj2_i8 = adj2 if adj2.dtype == jnp.int8 else adj2.astype(jnp.int8)

    n_src1 = n_id.shape[0]
    f_in = x.shape[1]
    n_dst1 = adj1.shape[0]
    n_dst2 = adj2.shape[0]
    hidden = prepped["hidden"]
    assert adj1.shape[1] == n_src1 and adj2.shape[1] == n_dst1

    kernel = functools.partial(_gatnet_fused_kernel,
                               out_channels=out_channels, n_src1=n_src1)

    def full(shape):
        n = len(shape)
        return pl.BlockSpec(shape, lambda i, n_id_ref, _n=n: (0,) * _n)

    # TODO(synk): for large neighbor samples, restructure as a flash-style reduction:
    # grid = (N_dst blocks = "parallel", N_src blocks = "arbitrary"), f32 num/den VMEM scratch
    # with a running per-head max + rescale, pl.when init/finalize; size adjacency tiles for
    # v7x's 64 MiB VMEM (<= [256 dst, 512 src] bf16, double-buffered) and use pl.Buffered(3)
    # on the adjacency spec on v5e if DMA stays exposed.  That tiling is also what enables the
    # v7x 2-TensorCore dst-parallel split; with the current fully-fused single block it would
    # only duplicate layer-1 work per block.
    out_pad = pl.pallas_call(
        kernel,
        out_shape=jax.ShapeDtypeStruct((n_dst2, LANE), jnp.float32),
        grid_spec=pltpu.PrefetchScalarGridSpec(
            num_scalar_prefetch=1,                  # n_id -> SMEM, used for the in-kernel gather
            grid=(1,),
            in_specs=[
                pl.BlockSpec(memory_space=pl.ANY),  # x stays in HBM; rows gathered via DMA
                full((n_dst1, n_src1)),             # adj layer 1     int8
                full((n_dst2, n_dst1)),             # adj layer 2     int8
                full((f_in, 2 * hidden)),           # [W1 | W1@A1]    bf16
                full((1, hidden)),                  # bias 1          f32
                full((hidden, 2 * LANE)),           # [W2 | W2@A2]    bf16 (lane-padded)
                full((1, LANE)),                    # bias 2          f32 (lane-padded)
            ],
            out_specs=full((n_dst2, LANE)),
            scratch_shapes=[
                pltpu.VMEM((n_src1, f_in), jnp.float32),   # gathered x rows
                pltpu.SemaphoreType.DMA((2,)),             # double-buffered row DMAs
            ],
        ),
        compiler_params=pltpu.CompilerParams(
            dimension_semantics=("arbitrary",),
            vmem_limit_bytes=32 * 1024 * 1024,      # above v5e's 16 MiB default scoped limit
        ),
    )(n_id, x, adj1_i8, adj2_i8,
      prepped["w1cat"], prepped["b1"], prepped["w2cat"], prepped["b2"])

    return out_pad[:, :out_channels]


def _reference_forward(params, x, data_flow, *, heads, out_channels):
    """Pure-JAX f32 reference of the same forward (source-only attention, no self-loops)."""
    n_id, adj1, adj2 = data_flow

    def gat(h_src, adj, w, att, b, n_heads):
        hc = w.shape[1]
        per = hc // n_heads
        h = h_src @ w                                                    # [Ns, hc]
        hh = h.reshape(-1, n_heads, per)
        logit = jnp.einsum("nhc,hc->nh", hh, att.reshape(n_heads, per))  # [Ns, H]
        s = jnp.where(logit > 0, logit, 0.2 * logit)
        mask = adj.astype(jnp.float32) > 0                               # [Nd, Ns]
        sm = jnp.where(mask[:, :, None], s[None, :, :], -jnp.inf)
        e = jnp.where(mask[:, :, None],
                      jnp.exp(s[None, :, :] - jnp.max(sm, axis=1, keepdims=True)), 0.0)
        alpha = e / jnp.sum(e, axis=1, keepdims=True)                    # [Nd, Ns, H]
        return jnp.einsum("dnh,nhc->dhc", alpha, hh).reshape(-1, hc) + b

    xs = x[n_id]
    h1 = gat(xs, adj1, params["w1"], params["att1"], params["b1"], heads)
    h1 = jnp.where(h1 > 0, h1, jnp.exp(h1) - 1.0)
    o2 = gat(h1, adj2, params["w2"], params["att2"], params["b2"], 1)
    return jax.nn.log_softmax(o2, axis=1)


def _glorot(key, shape):
    lim = jnp.sqrt(6.0 / (shape[0] + shape[1]))
    return jax.random.uniform(key, shape, jnp.float32, -lim, lim)


if __name__ == "__main__":
    in_channels, out_channels, heads = 32, 8, 8
    hidden = 128                                    # 8 heads * (128 // 8)
    n_total = 128
    n_src1, n_dst1 = 64, 32                         # data_flow[0].size (layer-1 bipartite block)
    n_dst2 = 16                                     # data_flow[1].size (layer-2 dst; src = n_dst1)

    key = jax.random.PRNGKey(0)
    ks = jax.random.split(key, 8)

    # Node features and a synthetic two-hop neighbor-sampler data_flow (adjacency stored int8).
    x = jax.random.normal(ks[0], (n_total, in_channels), jnp.float32)
    n_id = jax.random.permutation(ks[1], n_total)[:n_src1].astype(jnp.int32)
    adj1 = (jax.random.uniform(ks[2], (n_dst1, n_src1)) < 0.3)
    adj1 = adj1.at[jnp.arange(n_dst1), jnp.arange(n_dst1)].set(True).astype(jnp.int8)
    adj2 = (jax.random.uniform(ks[3], (n_dst2, n_dst1)) < 0.3)
    adj2 = adj2.at[jnp.arange(n_dst2), jnp.arange(n_dst2)].set(True).astype(jnp.int8)

    params = {
        "w1": _glorot(ks[4], (in_channels, hidden)),       # GATConv(in, 16, heads=8) weight
        "att1": _glorot(ks[5], (heads, hidden // heads)),  # att_src (source-only path)
        "b1": jnp.zeros((hidden,), jnp.float32),
        "w2": _glorot(ks[6], (hidden, out_channels)),      # GATConv(128, out, heads=1)
        "att2": _glorot(ks[7], (1, out_channels)),
        "b2": jnp.zeros((out_channels,), jnp.float32),
    }

    prepped = prepare_params(params, heads=heads, out_channels=out_channels)
    out = gatnet_forward(prepped, x, (n_id, adj1, adj2), out_channels=out_channels)
    out = jax.block_until_ready(out)

    assert out.shape == (n_dst2, out_channels)
    assert bool(jnp.all(jnp.isfinite(out)))
    # Rows of log_softmax must (exp-)sum to ~1.
    assert bool(jnp.allclose(jnp.sum(jnp.exp(out), axis=1), 1.0, atol=1e-3))
    # Loose parity vs the pure-f32 JAX reference (bf16 MXU + approx reciprocal => not bit-exact).
    ref = _reference_forward(params, x, (n_id, adj1, adj2),
                             heads=heads, out_channels=out_channels)
    assert float(jnp.max(jnp.abs(out - ref))) < 0.5
    print("KERNEL_OK")
</pallas_src>

<mosaic_0001>
module attributes {stable_mosaic.version = 11 : i64} {
  func.func @_gatnet_fused_kernel(%arg0: i32, %arg1: memref<64xi32, #tpu.memory_space<smem>>, %arg2: memref<128x32xf32, #tpu.memory_space<any>>, %arg3: memref<32x64xi8, #tpu.memory_space<vmem>>, %arg4: memref<16x32xi8, #tpu.memory_space<vmem>>, %arg5: memref<32x256xbf16, #tpu.memory_space<vmem>>, %arg6: memref<1x128xf32, #tpu.memory_space<vmem>>, %arg7: memref<128x256xbf16, #tpu.memory_space<vmem>>, %arg8: memref<1x128xf32, #tpu.memory_space<vmem>>, %arg9: memref<16x128xf32, #tpu.memory_space<vmem>>, %arg10: memref<64x32xf32, #tpu.memory_space<vmem>>, %arg11: memref<2x!tpu.dma_semaphore, #tpu.memory_space<semaphore_mem>>) attributes {dimension_semantics = [#tpu.dimension_semantics<arbitrary>], iteration_bounds = array<i64: 1>, scalar_prefetch = 1 : i64, scratch_operands = 2 : i64, tpu.core_type = #tpu.core_type<tc>, window_params = [{}, {pipeline_mode = #tpu.pipeline_mode<synchronous>, transform_indices = @transform_1, window_bounds = array<i64: 32, 64>}, {pipeline_mode = #tpu.pipeline_mode<synchronous>, transform_indices = @transform_2, window_bounds = array<i64: 16, 32>}, {pipeline_mode = #tpu.pipeline_mode<synchronous>, transform_indices = @transform_3, window_bounds = array<i64: 32, 256>}, {pipeline_mode = #tpu.pipeline_mode<synchronous>, transform_indices = @transform_4, window_bounds = array<i64: 1, 128>}, {pipeline_mode = #tpu.pipeline_mode<synchronous>, transform_indices = @transform_5, window_bounds = array<i64: 128, 256>}, {pipeline_mode = #tpu.pipeline_mode<synchronous>, transform_indices = @transform_6, window_bounds = array<i64: 1, 128>}, {pipeline_mode = #tpu.pipeline_mode<synchronous>, transform_indices = @transform_7, window_bounds = array<i64: 16, 128>}]} {
    %c0 = arith.constant 0 : index
    %0 = memref.load %arg1[%c0] : memref<64xi32, #tpu.memory_space<smem>>
    %c0_i32 = arith.constant 0 : i32
    %c0_i32_0 = arith.constant 0 : i32
    %1 = tpu.memref_slice %arg2[%0, %c0_i32_0] : memref<128x32xf32, #tpu.memory_space<any>> -> memref<1x32xf32, #tpu.memory_space<any>>
    %c0_i32_1 = arith.constant 0 : i32
    %c0_i32_2 = arith.constant 0 : i32
    %2 = tpu.memref_slice %arg10[%c0_i32_1, %c0_i32_2] : memref<64x32xf32, #tpu.memory_space<vmem>> -> memref<1x32xf32, #tpu.memory_space<vmem>>
    %3 = tpu.memref_slice %arg11[%c0_i32] : memref<2x!tpu.dma_semaphore, #tpu.memory_space<semaphore_mem>> -> memref<1x!tpu.dma_semaphore, #tpu.memory_space<semaphore_mem>>
    %4 = tpu.memref_squeeze %3 : memref<1x!tpu.dma_semaphore, #tpu.memory_space<semaphore_mem>> -> memref<!tpu.dma_semaphore, #tpu.memory_space<semaphore_mem>>
    tpu.enqueue_dma source(%1 : memref<1x32xf32, #tpu.memory_space<any>>) target(%2 : memref<1x32xf32, #tpu.memory_space<vmem>>) target_semaphore(%4 : memref<!tpu.dma_semaphore, #tpu.memory_space<semaphore_mem>>)
    %c0_i32_3 = arith.constant 0 : i32
    %c64_i32 = arith.constant 64 : i32
    %5 = arith.addi %c0_i32_3, %c64_i32 : i32
    %c1_i32 = arith.constant 1 : i32
    scf.for %arg12 = %c0_i32_3 to %5 step %c1_i32  : i32 {
      %c1_i32_38 = arith.constant 1 : i32
      %95 = arith.muli %arg12, %c1_i32_38 : i32
      %c0_i32_39 = arith.constant 0 : i32
      %96 = arith.addi %c0_i32_39, %95 : i32
      %c2_i32 = arith.constant 2 : i32
      %97 = arith.remsi %96, %c2_i32 : i32
      %c1_i32_40 = arith.constant 1 : i32
      %98 = arith.addi %96, %c1_i32_40 : i32
      %c64_i32_41 = arith.constant 64 : i32
      %99 = arith.cmpi slt, %98, %c64_i32_41 : i32
      %100 = arith.extui %99 : i1 to i32
      %c0_i32_42 = arith.constant 0 : i32
      %101 = arith.cmpi ne, %100, %c0_i32_42 : i32
      scf.if %101 {
        %c1_i32_46 = arith.constant 1 : i32
        %106 = arith.addi %96, %c1_i32_46 : i32
        %107 = arith.index_cast %106 : i32 to index
        %108 = memref.load %arg1[%107] : memref<64xi32, #tpu.memory_space<smem>>
        %c1_i32_47 = arith.constant 1 : i32
        %109 = arith.addi %96, %c1_i32_47 : i32
        %c1_i32_48 = arith.constant 1 : i32
        %110 = arith.subi %c1_i32_48, %97 : i32
        %c0_i32_49 = arith.constant 0 : i32
        %111 = tpu.memref_slice %arg2[%108, %c0_i32_49] : memref<128x32xf32, #tpu.memory_space<any>> -> memref<1x32xf32, #tpu.memory_space<any>>
        %c0_i32_50 = arith.constant 0 : i32
        %112 = tpu.memref_slice %arg10[%109, %c0_i32_50] : memref<64x32xf32, #tpu.memory_space<vmem>> -> memref<1x32xf32, #tpu.memory_space<vmem>>
        %113 = tpu.memref_slice %arg11[%110] : memref<2x!tpu.dma_semaphore, #tpu.memory_space<semaphore_mem>> -> memref<1x!tpu.dma_semaphore, #tpu.memory_space<semaphore_mem>>
        %114 = tpu.memref_squeeze %113 : memref<1x!tpu.dma_semaphore, #tpu.memory_space<semaphore_mem>> -> memref<!tpu.dma_semaphore, #tpu.memory_space<semaphore_mem>>
        tpu.enqueue_dma source(%111 : memref<1x32xf32, #tpu.memory_space<any>>) target(%112 : memref<1x32xf32, #tpu.memory_space<vmem>>) target_semaphore(%114 : memref<!tpu.dma_semaphore, #tpu.memory_space<semaphore_mem>>)
      } else {
      }
      %c0_i32_43 = arith.constant 0 : i32
      %c0_i32_44 = arith.constant 0 : i32
      %102 = tpu.memref_slice %arg2[%c0_i32_43, %c0_i32_44] : memref<128x32xf32, #tpu.memory_space<any>> -> memref<1x32xf32, #tpu.memory_space<any>>
      %c0_i32_45 = arith.constant 0 : i32
      %103 = tpu.memref_slice %arg10[%96, %c0_i32_45] : memref<64x32xf32, #tpu.memory_space<vmem>> -> memref<1x32xf32, #tpu.memory_space<vmem>>
      %104 = tpu.memref_slice %arg11[%97] : memref<2x!tpu.dma_semaphore, #tpu.memory_space<semaphore_mem>> -> memref<1x!tpu.dma_semaphore, #tpu.memory_space<semaphore_mem>>
      %105 = tpu.memref_squeeze %104 : memref<1x!tpu.dma_semaphore, #tpu.memory_space<semaphore_mem>> -> memref<!tpu.dma_semaphore, #tpu.memory_space<semaphore_mem>>
      tpu.wait_dma2 semaphore(%105 : memref<!tpu.dma_semaphore, #tpu.memory_space<semaphore_mem>>) src(%102 : memref<1x32xf32, #tpu.memory_space<any>>) dst(%103 : memref<1x32xf32, #tpu.memory_space<vmem>>)
    }
    %c64_i32_4 = arith.constant 64 : i32
    %c0_5 = arith.constant 0 : index
    %c0_6 = arith.constant 0 : index
    %6 = vector.load %arg10[%c0_5, %c0_6] : memref<64x32xf32, #tpu.memory_space<vmem>>, vector<64x32xf32>
    %7 = arith.truncf %6 : vector<64x32xf32> to vector<64x32xbf16>
    %c0_7 = arith.constant 0 : index
    %c0_8 = arith.constant 0 : index
    %8 = vector.load %arg3[%c0_7, %c0_8] : memref<32x64xi8, #tpu.memory_space<vmem>>, vector<32x64xi8>
    %9 = arith.sitofp %8 : vector<32x64xi8> to vector<32x64xf32>
    %10 = arith.truncf %9 : vector<32x64xf32> to vector<32x64xbf16>
    %c0_9 = arith.constant 0 : index
    %c0_10 = arith.constant 0 : index
    %11 = vector.load %arg4[%c0_9, %c0_10] : memref<16x32xi8, #tpu.memory_space<vmem>>, vector<16x32xi8>
    %12 = arith.sitofp %11 : vector<16x32xi8> to vector<16x32xf32>
    %13 = arith.truncf %12 : vector<16x32xf32> to vector<16x32xbf16>
    %c0_11 = arith.constant 0 : index
    %c0_12 = arith.constant 0 : index
    %14 = vector.load %arg5[%c0_11, %c0_12] : memref<32x256xbf16, #tpu.memory_space<vmem>>, vector<32x256xbf16>
    %c0_13 = arith.constant 0 : index
    %c0_14 = arith.constant 0 : index
    %15 = vector.load %arg6[%c0_13, %c0_14] : memref<1x128xf32, #tpu.memory_space<vmem>>, vector<1x128xf32>
    %cst = arith.constant dense<0.000000e+00> : vector<64x256xf32>
    %16 = tpu.matmul %7, %14, %cst {dimension_numbers = #tpu.dot_dimension_numbers<[1], [0], [0], [1], [0, 0, 1, 1], [], []>} : vector<64x32xbf16>, vector<32x256xbf16>, vector<64x256xf32> -> vector<64x256xf32>
    %17 = vector.extract_strided_slice %16 {offsets = [0, 0], sizes = [64, 128], strides = [1, 1]} : vector<64x256xf32> to vector<64x128xf32>
    %18 = vector.extract_strided_slice %16 {offsets = [0, 128], sizes = [64, 128], strides = [1, 1]} : vector<64x256xf32> to vector<64x128xf32>
    %cst_15 = arith.constant 0.000000e+00 : f32
    %19 = vector.broadcast %cst_15 : f32 to vector<64x128xf32>
    %20 = arith.cmpf ogt, %18, %19 : vector<64x128xf32>
    %cst_16 = arith.constant 2.000000e-01 : f32
    %21 = vector.broadcast %cst_16 : f32 to vector<64x128xf32>
    %22 = arith.mulf %21, %18 : vector<64x128xf32>
    %23 = arith.select %20, %18, %22 : vector<64x128xi1>, vector<64x128xf32>
    %cst_17 = arith.constant dense<0xFF800000> : vector<128xf32>
    %24 = vector.multi_reduction <maximumf>, %23, %cst_17 [0] : vector<64x128xf32> to vector<128xf32>
    %25 = vector.shape_cast %24 : vector<128xf32> to vector<1x128xf32>
    %26 = vector.broadcast %25 : vector<1x128xf32> to vector<64x128xf32>
    %27 = arith.subf %23, %26 : vector<64x128xf32>
    %28 = math.exp %27 : vector<64x128xf32>
    %29 = arith.mulf %17, %28 : vector<64x128xf32>
    %30 = arith.truncf %29 : vector<64x128xf32> to vector<64x128xbf16>
    %31 = arith.truncf %28 : vector<64x128xf32> to vector<64x128xbf16>
    %32 = tpu.concatenate %30, %31 in 1 : vector<64x128xbf16>, vector<64x128xbf16> -> vector<64x256xbf16>
    %cst_18 = arith.constant dense<0.000000e+00> : vector<32x256xf32>
    %33 = tpu.matmul %10, %32, %cst_18 {dimension_numbers = #tpu.dot_dimension_numbers<[1], [0], [0], [1], [0, 0, 1, 1], [], []>} : vector<32x64xbf16>, vector<64x256xbf16>, vector<32x256xf32> -> vector<32x256xf32>
    %34 = vector.extract_strided_slice %33 {offsets = [0, 0], sizes = [32, 128], strides = [1, 1]} : vector<32x256xf32> to vector<32x128xf32>
    %35 = vector.extract_strided_slice %33 {offsets = [0, 128], sizes = [32, 128], strides = [1, 1]} : vector<32x256xf32> to vector<32x128xf32>
    %cst_19 = arith.constant 1.000000e-16 : f32
    %36 = vector.broadcast %cst_19 : f32 to vector<32x128xf32>
    %37 = arith.maximumf %35, %36 : vector<32x128xf32>
    %38 = tpu.reciprocal %37 {approx = true} : vector<32x128xf32> -> vector<32x128xf32>
    %39 = arith.mulf %34, %38 : vector<32x128xf32>
    %40 = vector.broadcast %15 : vector<1x128xf32> to vector<32x128xf32>
    %41 = arith.addf %39, %40 : vector<32x128xf32>
    %cst_20 = arith.constant 0.000000e+00 : f32
    %42 = vector.broadcast %cst_20 : f32 to vector<32x128xf32>
    %43 = arith.cmpf ogt, %41, %42 : vector<32x128xf32>
    %44 = math.exp %41 : vector<32x128xf32>
    %cst_21 = arith.constant 1.000000e+00 : f32
    %45 = vector.broadcast %cst_21 : f32 to vector<32x128xf32>
    %46 = arith.subf %44, %45 : vector<32x128xf32>
    %47 = arith.select %43, %41, %46 : vector<32x128xi1>, vector<32x128xf32>
    %48 = arith.truncf %47 : vector<32x128xf32> to vector<32x128xbf16>
    %c0_22 = arith.constant 0 : index
    %c0_23 = arith.constant 0 : index
    %49 = vector.load %arg7[%c0_22, %c0_23] : memref<128x256xbf16, #tpu.memory_space<vmem>>, vector<128x256xbf16>
    %c0_24 = arith.constant 0 : index
    %c0_25 = arith.constant 0 : index
    %50 = vector.load %arg8[%c0_24, %c0_25] : memref<1x128xf32, #tpu.memory_space<vmem>>, vector<1x128xf32>
    %cst_26 = arith.constant dense<0.000000e+00> : vector<32x256xf32>
    %51 = tpu.matmul %48, %49, %cst_26 {dimension_numbers = #tpu.dot_dimension_numbers<[1], [0], [0], [1], [0, 0, 1, 1], [], []>} : vector<32x128xbf16>, vector<128x256xbf16>, vector<32x256xf32> -> vector<32x256xf32>
    %52 = vector.extract_strided_slice %51 {offsets = [0, 0], sizes = [32, 128], strides = [1, 1]} : vector<32x256xf32> to vector<32x128xf32>
    %53 = vector.extract_strided_slice %51 {offsets = [0, 128], sizes = [32, 128], strides = [1, 1]} : vector<32x256xf32> to vector<32x128xf32>
    %cst_27 = arith.constant 0.000000e+00 : f32
    %54 = vector.broadcast %cst_27 : f32 to vector<32x128xf32>
    %55 = arith.cmpf ogt, %53, %54 : vector<32x128xf32>
    %cst_28 = arith.constant 2.000000e-01 : f32
    %56 = vector.broadcast %cst_28 : f32 to vector<32x128xf32>
    %57 = arith.mulf %56, %53 : vector<32x128xf32>
    %58 = arith.select %55, %53, %57 : vector<32x128xi1>, vector<32x128xf32>
    %cst_29 = arith.constant dense<0xFF800000> : vector<128xf32>
    %59 = vector.multi_reduction <maximumf>, %58, %cst_29 [0] : vector<32x128xf32> to vector<128xf32>
    %60 = vector.shape_cast %59 : vector<128xf32> to vector<1x128xf32>
    %61 = vector.broadcast %60 : vector<1x128xf32> to vector<32x128xf32>
    %62 = arith.subf %58, %61 : vector<32x128xf32>
    %63 = math.exp %62 : vector<32x128xf32>
    %64 = arith.mulf %52, %63 : vector<32x128xf32>
    %65 = arith.truncf %64 : vector<32x128xf32> to vector<32x128xbf16>
    %66 = arith.truncf %63 : vector<32x128xf32> to vector<32x128xbf16>
    %67 = tpu.concatenate %65, %66 in 1 : vector<32x128xbf16>, vector<32x128xbf16> -> vector<32x256xbf16>
    %cst_30 = arith.constant dense<0.000000e+00> : vector<16x256xf32>
    %68 = tpu.matmul %13, %67, %cst_30 {dimension_numbers = #tpu.dot_dimension_numbers<[1], [0], [0], [1], [0, 0, 1, 1], [], []>} : vector<16x32xbf16>, vector<32x256xbf16>, vector<16x256xf32> -> vector<16x256xf32>
    %69 = vector.extract_strided_slice %68 {offsets = [0, 0], sizes = [16, 128], strides = [1, 1]} : vector<16x256xf32> to vector<16x128xf32>
    %70 = vector.extract_strided_slice %68 {offsets = [0, 128], sizes = [16, 128], strides = [1, 1]} : vector<16x256xf32> to vector<16x128xf32>
    %cst_31 = arith.constant 1.000000e-16 : f32
    %71 = vector.broadcast %cst_31 : f32 to vector<16x128xf32>
    %72 = arith.maximumf %70, %71 : vector<16x128xf32>
    %73 = tpu.reciprocal %72 {approx = true} : vector<16x128xf32> -> vector<16x128xf32>
    %74 = arith.mulf %69, %73 : vector<16x128xf32>
    %75 = vector.broadcast %50 : vector<1x128xf32> to vector<16x128xf32>
    %76 = arith.addf %74, %75 : vector<16x128xf32>
    %77 = tpu.iota {dimensions = array<i32: 1>} : vector<16x128xi32>
    %c8_i32 = arith.constant 8 : i32
    %78 = vector.broadcast %c8_i32 : i32 to vector<16x128xi32>
    %79 = arith.cmpi slt, %77, %78 : vector<16x128xi32>
    %cst_32 = arith.constant -1.000000e+30 : f32
    %80 = vector.broadcast %cst_32 : f32 to vector<16x128xf32>
    %81 = arith.select %79, %76, %80 : vector<16x128xi1>, vector<16x128xf32>
    %cst_33 = arith.constant dense<0xFF800000> : vector<16xf32>
    %82 = vector.multi_reduction <maximumf>, %81, %cst_33 [1] : vector<16x128xf32> to vector<16xf32>
    %83 = vector.shape_cast %82 : vector<16xf32> to vector<16x1xf32>
    %84 = vector.broadcast %83 : vector<16x1xf32> to vector<16x128xf32>
    %85 = arith.subf %81, %84 : vector<16x128xf32>
    %86 = math.exp %85 : vector<16x128xf32>
    %cst_34 = arith.constant 0.000000e+00 : f32
    %87 = vector.broadcast %cst_34 : f32 to vector<16x128xf32>
    %88 = arith.select %79, %86, %87 : vector<16x128xi1>, vector<16x128xf32>
    %cst_35 = arith.constant dense<0.000000e+00> : vector<16xf32>
    %89 = vector.multi_reduction <add>, %88, %cst_35 [1] : vector<16x128xf32> to vector<16xf32>
    %90 = vector.shape_cast %89 : vector<16xf32> to vector<16x1xf32>
    %91 = math.log %90 : vector<16x1xf32>
    %92 = vector.broadcast %91 : vector<16x1xf32> to vector<16x128xf32>
    %93 = arith.subf %85, %92 : vector<16x128xf32>
    %c0_36 = arith.constant 0 : index
    %c0_37 = arith.constant 0 : index
    %94 = vector.load %arg9[%c0_36, %c0_37] : memref<16x128xf32, #tpu.memory_space<vmem>>, vector<16x128xf32>
    tpu.vector_store %arg9[%c0_36, %c0_37], %93 {strides = array<i32>} : memref<16x128xf32, #tpu.memory_space<vmem>>, vector<16x128xf32>,
    return
  }
  func.func @transform_1(%arg0: i32, %arg1: memref<64xi32, #tpu.memory_space<smem>>) -> (i32, i32) {
    %c0_i32 = arith.constant 0 : i32
    %c0_i32_0 = arith.constant 0 : i32
    %c0_i32_1 = arith.constant 0 : i32
    return %c0_i32, %c0_i32_0 : i32, i32
  }
  func.func @transform_2(%arg0: i32, %arg1: memref<64xi32, #tpu.memory_space<smem>>) -> (i32, i32) {
    %c0_i32 = arith.constant 0 : i32
    %c0_i32_0 = arith.constant 0 : i32
    %c0_i32_1 = arith.constant 0 : i32
    return %c0_i32, %c0_i32_0 : i32, i32
  }
  func.func @transform_3(%arg0: i32, %arg1: memref<64xi32, #tpu.memory_space<smem>>) -> (i32, i32) {
    %c0_i32 = arith.constant 0 : i32
    %c0_i32_0 = arith.constant 0 : i32
    %c0_i32_1 = arith.constant 0 : i32
    return %c0_i32, %c0_i32_0 : i32, i32
  }
  func.func @transform_4(%arg0: i32, %arg1: memref<64xi32, #tpu.memory_space<smem>>) -> (i32, i32) {
    %c0_i32 = arith.constant 0 : i32
    %c0_i32_0 = arith.constant 0 : i32
    %c0_i32_1 = arith.constant 0 : i32
    return %c0_i32, %c0_i32_0 : i32, i32
  }
  func.func @transform_5(%arg0: i32, %arg1: memref<64xi32, #tpu.memory_space<smem>>) -> (i32, i32) {
    %c0_i32 = arith.constant 0 : i32
    %c0_i32_0 = arith.constant 0 : i32
    %c0_i32_1 = arith.constant 0 : i32
    return %c0_i32, %c0_i32_0 : i32, i32
  }
  func.func @transform_6(%arg0: i32, %arg1: memref<64xi32, #tpu.memory_space<smem>>) -> (i32, i32) {
    %c0_i32 = arith.constant 0 : i32
    %c0_i32_0 = arith.constant 0 : i32
    %c0_i32_1 = arith.constant 0 : i32
    return %c0_i32, %c0_i32_0 : i32, i32
  }
  func.func @transform_7(%arg0: i32, %arg1: memref<64xi32, #tpu.memory_space<smem>>) -> (i32, i32) {
    %c0_i32 = arith.constant 0 : i32
    %c0_i32_0 = arith.constant 0 : i32
    %c0_i32_1 = arith.constant 0 : i32
    return %c0_i32, %c0_i32_0 : i32, i32
  }
}

</mosaic_0001>

<bundles_post_ra>
// kernel: tpu_custom_call.1
= control target key start
LH: loop header
LB: loop body
LE: loop exit
PB: predicated region body
PF: predicated region fallthrough
CT: control target
= control target key end

     0   :  { %s1176_s0 = inlined_call_operand.vmem [shape: s32[64], index: 0, kind: input, shape index: {}]   ;;  %s1177_s1 = inlined_call_operand.vmem [shape: f32[128,32], index: 1, kind: input, shape index: {}]   ;;  %s1178_s2 = inlined_call_operand.vmem [shape: s8[32,64], index: 2, kind: input, shape index: {}]   ;;  %s1179_s3 = inlined_call_operand.vmem [shape: s8[16,32], index: 3, kind: input, shape index: {}]   ;;  %s1180_s4 = inlined_call_operand.vmem [shape: bf16[32,256], index: 4, kind: input, shape index: {}]   ;;  %s1181_s5 = inlined_call_operand.vmem [shape: f32[1,128], index: 5, kind: input, shape index: {}]   ;;  %s1182_s6 = inlined_call_operand.vmem [shape: bf16[128,256], index: 6, kind: input, shape index: {}]   ;;  %s1183_s7 = inlined_call_operand.vmem [shape: f32[1,128], index: 7, kind: input, shape index: {}]   ;;  %s1184_s8 = inlined_call_operand.hbm [shape: f32[16,128], index: 8, kind: output, shape index: {}]  }
   0x1   :  { %s13_s29 = sshll.u32 %s1176_s0, 4  ;;  %s14_s29 = int_to_ptr.vmem [resolvable:$true] %s13_s29 }
   0x2   :  { %s941_s30 = scalar_lea.vmem %s14_s29, 16  ;;  %p946_p1 = scmp.lt.s32.totalorder %s14_s29, %s14_s29 }
   0x3   :  { %p942_p0 = scmp.ne.s32.totalorder %s14_s29, %s941_s30  ;;  %p947_p2 = scmp.lt.s32.totalorder %s941_s30, %s941_s30 }
   0x5   :  { %p948_p3 = por %p947_p2, %p946_p1 }
   0x7   :  { %p949_p4 = pnand %p948_p3, %p942_p0 }
   0x9   :  { %952 = shalt.err (!%p949_p4)  }
   0xa   :  { %s989_s9 = smov [#allocation5]  }
   0xb   :  { %16 = dma.vmem_to_smem %s14_s29, 16, %s989_s9, [#allocation4] }
   0xc   :  { %979 = dma.done.wait [#allocation4], 16 }
   0xd   :  { %980 = vsyncadd [#allocation4], 4294967280 }
   0xe   :  { %18 = sfence }
   0xf   :  { %19 = vsyncpa [#allocation7], 0  ;;  %s33_s10 = sld [smem:[#allocation5]] }
  0x15   :  { %s34_s13 = scalar_lea.vmem %s1177_s1, %s33_s10 }
  0x16   :  { %v52_v0 = vld [vmem:[%s34_s13] sm:$0x1] }
  0x17   :  { %53 = vst [vmem:[#allocation2] sm:$0x1] %v52_v0 }
  0x18   :  { %78 = vsyncadd [#allocation3], 16  ;;  %s985_s0 = smov 0  }
  0x19 LB: > { %p85_p5 = scmp.lt.s32.totalorder %s987_s0, 0  ;;  %s86_s14 = ssub.s32 0, %s987_s0  ;;  %s987_s0 = sphi %s985_s0, %s986_s0  }
  0x1a   : > { %s806_s15 = smin.u32 %s987_s0, %s86_s14  ;;  %s91_s16 = sadd.s32 1, %s987_s0  }
  0x1b   : > { %s88_s17 = sand.u32 1, %s806_s15   ;;  %p807_p6 = scmp.ge.s32.totalorder %s91_s16, 64 }
  0x1c   : > { %s89_s18 = ssub.s32 0, %s88_s17  ;;  %s96_s19 = sld [smem:[#allocation5 + %s91_s16]] (!%p807_p6) }
  0x1d   : > { %s1186_s18 = smov (!%p85_p5, %s89_s18), %s88_s17  ;;  %95 = sbr.rel (%p807_p6) target bundleno = 38 (0x26), region = 66 }
  0x1e   : > { %s97_s20 = ssub.s32 (!%p807_p6), 1, %s1186_s18  ;;  %s778_s24 = scalar_lea.vmem (!%p807_p6), [#allocation2], %s987_s0 }
  0x1f   : > { %s100_s25 = scalar_lea.sflag (!%p807_p6), [#allocation3], %s97_s20 }
  0x22   : > { %s98_s23 = scalar_lea.vmem (!%p807_p6), %s1177_s1, %s96_s19 }
  0x23   : > { %v118_v1 = vld [vmem:[%s98_s23] sm:$0x1] (!%p807_p6) }
  0x24   : > { %809 = vst [vmem:[%s778_s24 + $0x1] sm:$0x1] %v118_v1 }
  0x25   : > { %144 = vsyncadd %s100_s25, 16 }
  0x26 PF: > { %s145_s26 = scalar_lea.sflag [#allocation3], %s1186_s18 }
  0x27   : > { %981 = dma.done.wait %s145_s26, 16 }
  0x28   : > { %982 = vsyncadd %s145_s26, 4294967280  ;;  %s986_s0 = smov %s91_s16   ;;  %83 = sbr.rel (!%p807_p6) target bundleno = 25 (0x19), region = 141  ;;  %v859_v2 = vld [vmem:[%s1180_s4 + $0x4] ss:$8 sps:$4 sm:$0xff] (%p807_p6)   ;;  %v861_v3 = vld [vmem:[%s1180_s4] ss:$8 sps:$4 sm:$0xff] (%p807_p6)  }
  0x29   :  { %v990_v4 = vmov (%p807_p6), 0   ;;  %206 = vmatprep.subr.bf16.mxu0 (%p807_p6), %v859_v2  ;;  %v862_v5 = vld [vmem:[%s1180_s4 + $0x14] ss:$8 sps:$4 sm:$0xff] (%p807_p6)   ;;  %v864_v6 = vld [vmem:[%s1180_s4 + $0x10] ss:$8 sps:$4 sm:$0xff] (%p807_p6)   ;;  %vm193_vm0 = vcmask (%p807_p6), 261120  }
  0x2a   :  { %238 = vmatprep.mubr.bf16.mxu0 (%p807_p6), %v990_v4  ;;  %395 = vmatprep.mubr.bf16.mxu1 (%p807_p6), %v990_v4  ;;  %vm356_vm9 = vcmask (%p807_p6), 523264  }
  0x2b   :  { %207 = vmatpush1.bf16.msra.mxu0 (%p807_p6), %v861_v3 }
  0x2c   :  { %208 = vmatprep.subr.bf16.mxu0 (%p807_p6), %v862_v5 }
  0x2d   :  { %v149_v7 = vld [vmem:[#allocation2] sm:$0xff] (%p807_p6)  ;;  %v150_v8 = vld [vmem:[#allocation2 + $0x8] sm:$0xff] (%p807_p6)  ;;  %v151_v10 = vld [vmem:[#allocation2 + $0x10] sm:$0xff] (%p807_p6) }
  0x2e   :  { %v157_v9 = vpack.c.bf16 (%p807_p6), %v150_v8, %v149_v7  ;;  %v152_v11 = vld [vmem:[#allocation2 + $0x18] sm:$0xff] (%p807_p6)  ;;  %v153_v13 = vld [vmem:[#allocation2 + $0x20] sm:$0xff] (%p807_p6)  ;;  %v154_v14 = vld [vmem:[#allocation2 + $0x28] sm:$0xff] (%p807_p6) }
  0x2f   :  { %209 = vmatpush1.bf16.msra.mxu0 %v864_v6  ;;  %v158_v12 = vpack.c.bf16 %v152_v11, %v151_v10  ;;  %v159_v15 = vpack.c.bf16 %v154_v14, %v153_v13  ;;  %v155_v16 = vld [vmem:[#allocation2 + $0x30] sm:$0xff]  ;;  %v156_v17 = vld [vmem:[#allocation2 + $0x38] sm:$0xff] }
  0x30   :  { %v160_v18 = vpack.c.bf16 %v156_v17, %v155_v16 }
  0x32   :  { %814 = vmatmul.mubr.msk.bf16.vlgmr.msra.gmra.mrb[0].mxu0 %vm193_vm0, %v157_v9 }
  0x33   :  { %248 = vmatprep.mubr.bf16.mxu0 %v990_v4 }
  0x3a   :  { %815 = vmatmul.mubr.msk.bf16.gmra.mrb[4].mxu0 %vm193_vm0, %v158_v12 }
  0x3b   :  { %258 = vmatprep.mubr.bf16.mxu0 %v990_v4 }
  0x42   :  { %816 = vmatmul.mubr.msk.bf16.gmra.mrb[8].mxu0 %vm193_vm0, %v159_v15 }
  0x43   :  { %268 = vmatprep.mubr.bf16.mxu0 %v990_v4 }
  0x4a   :  { %817 = vmatmul.mubr.msk.bf16.gmra.mrb[12].mxu0 %vm193_vm0, %v160_v18 }
  0x4b   :  { %589 = vmatprep.mubr.bf16.mxu0 %v990_v4 }
 0x105   :  { %v1072_v19 = vpop.f32.mrb[0].mxu0 }
 0x106   :  { %v242_v20 = vpop.f32.mrb[1].mxu0 }
 0x107   :  { %v1074_v21 = vpop.f32.mrb[2].mxu0  ;;  %v287_v27 = vmul.f32 0.2, %v242_v20  ;;  %vm279_vm1 = vcmp.gt.f32.partialorder %v242_v20, 0.0 }
 0x108   :  { %v246_v22 = vpop.f32.mrb[3].mxu0 }
 0x109   :  { %v288_v30 = vmul.f32 0.2, %v246_v22  ;;  %vm280_vm3 = vcmp.gt.f32.partialorder %v246_v22, 0.0  ;;  %v295_v34 = vsel %vm279_vm1, %v242_v20, %v287_v27 }
 0x10b   :  { %v296_v38 = vsel %vm280_vm3, %v246_v22, %v288_v30 }
 0x10d   :  { %v1076_v23 = vpop.f32.mrb[4].mxu0 }
 0x10e   :  { %v252_v24 = vpop.f32.mrb[5].mxu0 }
 0x10f   :  { %v1078_v25 = vpop.f32.mrb[6].mxu0  ;;  %v289_v41 = vmul.f32 0.2, %v252_v24  ;;  %vm281_vm5 = vcmp.gt.f32.partialorder %v252_v24, 0.0 }
 0x110   :  { %v256_v26 = vpop.f32.mrb[7].mxu0 }
 0x111   :  { %v290_v45 = vmul.f32 0.2, %v256_v26  ;;  %vm282_vm7 = vcmp.gt.f32.partialorder %v256_v26, 0.0  ;;  %v297_v49 = vsel %vm281_vm5, %v252_v24, %v289_v41 }
 0x113   :  { %v298_v53 = vsel %vm282_vm7, %v256_v26, %v290_v45  ;;  %v865_v45 = vld [vmem:[%s1182_s6] ss:$8 sps:$4 sm:$0xff]  }
 0x115   :  { %v1080_v28 = vpop.f32.mrb[8].mxu0 }
 0x116   :  { %v262_v29 = vpop.f32.mrb[9].mxu0 }
 0x117   :  { %vm283_vm2 = vcmp.gt.f32.partialorder %v262_v29, 0.0  ;;  %v291_v31 = vmul.f32 0.2, %v262_v29  ;;  %v1082_v32 = vpop.f32.mrb[10].mxu0 }
 0x118   :  { %v266_v33 = vpop.f32.mrb[11].mxu0 }
 0x119   :  { %v299_v35 = vsel %vm283_vm2, %v262_v29, %v291_v31  ;;  %vm284_vm4 = vcmp.gt.f32.partialorder %v266_v33, 0.0  ;;  %v292_v36 = vmul.f32 0.2, %v266_v33 }
 0x11a   :  { %v303_v37 = vmax.f32 %v295_v34, %v299_v35 }
 0x11b   :  { %v300_v39 = vsel %vm284_vm4, %v266_v33, %v292_v36 }
 0x11c   :  { %v304_v40 = vmax.f32 %v296_v38, %v300_v39 }
 0x11d   :  { %v1084_v42 = vpop.f32.mrb[12].mxu0 }
 0x11e   :  { %v307_v43 = vmax.f32 %v303_v37, %v304_v40  ;;  %v272_v44 = vpop.f32.mrb[13].mxu0 }
 0x11f   :  { %vm285_vm6 = vcmp.gt.f32.partialorder %v272_v44, 0.0  ;;  %v293_v46 = vmul.f32 0.2, %v272_v44  ;;  %v274_v47 = vpop.f32.mrb[14].mxu0 }
 0x120   :  { %v276_v48 = vpop.f32.mrb[15].mxu0 }
 0x121   :  { %v301_v50 = vsel %vm285_vm6, %v272_v44, %v293_v46  ;;  %vm286_vm8 = vcmp.gt.f32.partialorder %v276_v48, 0.0  ;;  %v294_v51 = vmul.f32 0.2, %v276_v48  ;;  %v870_v46 = vld [vmem:[%s1182_s6 + $0x14] ss:$8 sps:$4 sm:$0xff]  }
 0x122   :  { %v305_v52 = vmax.f32 %v297_v49, %v301_v50 }
 0x123   :  { %v302_v54 = vsel %vm286_vm8, %v276_v48, %v294_v51  ;;  %v873_v48 = vld [vmem:[%s1182_s6 + $0x24] ss:$8 sps:$4 sm:$0xff]   ;;  %v874_v51 = vld [vmem:[%s1182_s6 + $0x30] ss:$8 sps:$4 sm:$0xff]  }
 0x124   :  { %v306_v55 = vmax.f32 %v298_v53, %v302_v54 }
 0x126   :  { %v308_v56 = vmax.f32 %v305_v52, %v306_v55  ;;  %v879_v52 = vld [vmem:[%s1182_s6 + $0x44] ss:$8 sps:$4 sm:$0xff]   ;;  %v880_v55 = vld [vmem:[%s1182_s6 + $0x50] ss:$8 sps:$4 sm:$0xff]  }
 0x128   :  { %v309_v57 = vmax.f32 %v307_v43, %v308_v56  ;;  %v885_v56 = vld [vmem:[%s1182_s6 + $0x64] ss:$8 sps:$4 sm:$0xff]  }
 0x12a   :  { %v310_v58 = vrot.slane %v309_v57, 4 }
 0x12c   :  { %v311_v59 = vmax.f32 %v309_v57, %v310_v58  ;;  %v883_v57 = vld [vmem:[%s1182_s6 + $0x60] ss:$8 sps:$4 sm:$0xff]   ;;  %v888_v58 = vld [vmem:[%s1182_s6 + $0x74] ss:$8 sps:$4 sm:$0xff]  }
 0x12e   :  { %v312_v60 = vrot.slane %v311_v59, 2 }
 0x130   :  { %v313_v61 = vmax.f32 %v311_v59, %v312_v60  ;;  %v886_v59 = vld [vmem:[%s1182_s6 + $0x70] ss:$8 sps:$4 sm:$0xff]  }
 0x132   :  { %v314_v62 = vrot.slane %v313_v61, 1 }
 0x134   :  { %v315_v63 = vmax.f32 %v313_v61, %v314_v62 }
 0x136   :  { %v323_v0 = vsub.f32 %v302_v54, %v315_v63  ;;  %v316_v1 = vsub.f32 %v295_v34, %v315_v63  ;;  %v317_v2 = vsub.f32 %v296_v38, %v315_v63  ;;  %v318_v3 = vsub.f32 %v297_v49, %v315_v63  ;;  %v871_v49 = vld [vmem:[%s1182_s6 + $0x20] ss:$8 sps:$4 sm:$0xff]   ;;  %v882_v54 = vld [vmem:[%s1182_s6 + $0x54] ss:$8 sps:$4 sm:$0xff]  }
 0x137   :  { %v319_v5 = vsub.f32 %v298_v53, %v315_v63  ;;  %v320_v6 = vsub.f32 %v299_v35, %v315_v63  ;;  %v321_v7 = vsub.f32 %v300_v39, %v315_v63  ;;  %v322_v8 = vsub.f32 %v301_v50, %v315_v63  ;;  %v876_v50 = vld [vmem:[%s1182_s6 + $0x34] ss:$8 sps:$4 sm:$0xff]   ;;  %v877_v53 = vld [vmem:[%s1182_s6 + $0x40] ss:$8 sps:$4 sm:$0xff]  }
 0x138   :  { %v338_v9 = vmul.f32 1.442695, %v323_v0  ;;  %v324_v10 = vmul.f32 1.442695, %v316_v1  ;;  %v326_v11 = vmul.f32 1.442695, %v317_v2 }
 0x139   :  { %v328_v12 = vmul.f32 1.442695, %v318_v3  ;;  %v330_v13 = vmul.f32 1.442695, %v319_v5  ;;  %v332_v14 = vmul.f32 1.442695, %v320_v6 }
 0x13a   :  { %889 = vpow2.f32 %v338_v9  ;;  %v334_v15 = vmul.f32 1.442695, %v321_v7  ;;  %v336_v16 = vmul.f32 1.442695, %v322_v8 }
 0x13b   :  { %891 = vpow2.f32 %v324_v10  ;;  %v820_v10 = vld [vmem:[%s1181_s5] ss:$0 sm:$0xff] }
 0x13c   :  { %893 = vpow2.f32 %v326_v11 }
 0x13d   :  { %895 = vpow2.f32 %v328_v12 }
 0x13e   :  { %897 = vpow2.f32 %v330_v13 }
 0x13f   :  { %899 = vpow2.f32 %v332_v14 }
 0x140   :  { %901 = vpow2.f32 %v334_v15 }
 0x141   :  { %903 = vpow2.f32 %v336_v16 }
 0x144   :  { %v890_v17 = vpop.eup %889 }
 0x145   :  { %v892_v18 = vpop.eup %891  ;;  %v347_v20 = vmul.f32 %v890_v17, %v274_v47  ;;  %v868_v47 = vld [vmem:[%s1182_s6 + $0x10] ss:$8 sps:$4 sm:$0xff]  }
 0x146   :  { %v894_v22 = vpop.eup %893  ;;  %v340_v24 = vmul.f32 %v892_v18, %v1072_v19 }
 0x147   :  { %v896_v26 = vpop.eup %895  ;;  %v352_v27 = vpack.c.bf16 %v894_v22, %v892_v18  ;;  %v341_v29 = vmul.f32 %v894_v22, %v1074_v21 }
 0x148   :  { %v898_v30 = vpop.eup %897  ;;  %v342_v31 = vmul.f32 %v896_v26, %v1076_v23 }
 0x149   :  { %v900_v33 = vpop.eup %899  ;;  %363 = vmatprep.subr.bf16.mxu1 %v352_v27  ;;  %v348_v34 = vpack.c.bf16 %v341_v29, %v340_v24  ;;  %v353_v35 = vpack.c.bf16 %v898_v30, %v896_v26  ;;  %v343_v36 = vmul.f32 %v898_v30, %v1078_v25  ;;  %v161_v25 = vld [vmem:[%s1178_s2] sm:$0xff] }
 0x14a   :  { %v902_v37 = vpop.eup %901  ;;  %v344_v38 = vmul.f32 %v900_v33, %v1080_v28  ;;  %v162_v28 = vunpack.c.l.s8.bf16 %v161_v25 }
 0x14b   :  { %v904_v39 = vpop.eup %903  ;;  %364 = vmatpush1.bf16.msra.mxu1 %v348_v34  ;;  %v349_v40 = vpack.c.bf16 %v343_v36, %v342_v31  ;;  %v354_v19 = vpack.c.bf16 %v902_v37, %v900_v33  ;;  %v345_v41 = vmul.f32 %v902_v37, %v1082_v32  ;;  %v163_v32 = vunpack.c.h.s8.bf16 %v161_v25 }
 0x14c   :  { %365 = vmatprep.subr.bf16.mxu1 %v353_v35  ;;  %v355_v21 = vpack.c.bf16 %v890_v17, %v904_v39  ;;  %v346_v43 = vmul.f32 %v904_v39, %v1084_v42  ;;  %v867_v42 = vld [vmem:[%s1182_s6 + $0x4] ss:$8 sps:$4 sm:$0xff]  }
 0x14d   :  { %v350_v23 = vpack.c.bf16 %v345_v41, %v344_v38  ;;  %557 = vmatprep.subr.bf16.mxu0 %v867_v42 }
 0x14e   :  { %v351_v44 = vpack.c.bf16 %v347_v20, %v346_v43  ;;  %558 = vmatpush1.bf16.msra.mxu0 %v865_v45 }
 0x14f   :  { %366 = vmatpush1.bf16.msra.mxu1 %v349_v40  ;;  %559 = vmatprep.subr.bf16.mxu0 %v870_v46 }
 0x150   :  { %367 = vmatprep.subr.bf16.mxu1 %v354_v19 }
 0x152   :  { %560 = vmatpush1.bf16.msra.mxu0 %v868_v47 }
 0x153   :  { %368 = vmatpush1.bf16.msra.mxu1 %v350_v23  ;;  %561 = vmatprep.subr.bf16.mxu0 %v873_v48 }
 0x154   :  { %369 = vmatprep.subr.bf16.mxu1 %v355_v21 }
 0x156   :  { %562 = vmatpush1.bf16.msra.mxu0 %v871_v49 }
 0x157   :  { %370 = vmatpush1.bf16.msra.mxu1 %v351_v44  ;;  %563 = vmatprep.subr.bf16.mxu0 %v876_v50 }
 0x15a   :  { %818 = vmatmul.mubr.msk.bf16.vlgmr.msra.gmra.mrb[0].mxu1 %vm356_vm9, %v162_v28  ;;  %564 = vmatpush1.bf16.msra.mxu0 %v874_v51 }
 0x15b   :  { %405 = vmatprep.mubr.bf16.mxu1 %v990_v4  ;;  %565 = vmatprep.subr.bf16.mxu0 %v879_v52 }
 0x15e   :  { %566 = vmatpush1.bf16.msra.mxu0 %v877_v53 }
 0x15f   :  { %567 = vmatprep.subr.bf16.mxu0 %v882_v54 }
 0x162   :  { %819 = vmatmul.mubr.msk.bf16.gmra.mrb[4].mxu1 %vm356_vm9, %v163_v32  ;;  %568 = vmatpush1.bf16.msra.mxu0 %v880_v55 }
 0x163   :  { %691 = vmatprep.mubr.bf16.mxu1 %v990_v4  ;;  %569 = vmatprep.subr.bf16.mxu0 %v885_v56 }
 0x166   :  { %570 = vmatpush1.bf16.msra.mxu0 %v883_v57 }
 0x167   :  { %571 = vmatprep.subr.bf16.mxu0 %v888_v58 }
 0x16a   :  { %572 = vmatpush1.bf16.msra.mxu0 %v886_v59 }
 0x22d   :  { %v397_v60 = vpop.f32.mrb[0].mxu1 }
 0x22e   :  { %v399_v61 = vpop.f32.mrb[1].mxu1 }
 0x22f   :  { %v416_v62 = vmax.f32 %v399_v61, 1e-16  ;;  %v401_v63 = vpop.f32.mrb[2].mxu1 }
 0x230   :  { %v403_v0 = vpop.f32.mrb[3].mxu1 }
 0x231   :  { %905 = vrcp.f32 %v416_v62  ;;  %v417_v1 = vmax.f32 %v403_v0, 1e-16 }
 0x233   :  { %907 = vrcp.f32 %v417_v1 }
 0x235   :  { %v407_v2 = vpop.f32.mrb[4].mxu1 }
 0x236   :  { %v409_v3 = vpop.f32.mrb[5].mxu1 }
 0x237   :  { %v418_v5 = vmax.f32 %v409_v3, 1e-16  ;;  %v411_v6 = vpop.f32.mrb[6].mxu1 }
 0x238   :  { %v413_v7 = vpop.f32.mrb[7].mxu1 }
 0x239   :  { %909 = vrcp.f32 %v418_v5  ;;  %v419_v8 = vmax.f32 %v413_v7, 1e-16 }
 0x23b   :  { %v906_v9 = vpop.eup %905  ;;  %911 = vrcp.f32 %v419_v8 }
 0x23c   :  { %v424_v11 = vmul.f32 %v906_v9, %v397_v60 }
 0x23d   :  { %v908_v12 = vpop.eup %907 }
 0x23e   :  { %v434_v13 = vadd.f32 %v820_v10, %v424_v11  ;;  %v425_v14 = vmul.f32 %v908_v12, %v401_v63 }
 0x240   :  { %v442_v15 = vmul.f32 1.442695, %v434_v13  ;;  %v435_v16 = vadd.f32 %v820_v10, %v425_v14  ;;  %vm438_vm10 = vcmp.gt.f32.partialorder %v434_v13, 0.0 }
 0x242   :  { %913 = vpow2.f32 %v442_v15  ;;  %v444_v17 = vmul.f32 1.442695, %v435_v16  ;;  %vm439_vm11 = vcmp.gt.f32.partialorder %v435_v16, 0.0 }
 0x243   :  { %v910_v18 = vpop.eup %909 }
 0x244   :  { %915 = vpow2.f32 %v444_v17  ;;  %v426_v20 = vmul.f32 %v910_v18, %v407_v2  ;;  %v164_v17 = vld [vmem:[%s1179_s3] sm:$0x3]  ;;  %v165_v18 = vld [vmem:[%s1179_s3 + $0x2] sm:$0x3] }
 0x245   :  { %v912_v22 = vpop.eup %911 }
 0x246   :  { %v427_v24 = vmul.f32 %v912_v22, %v411_v6  ;;  %v436_v26 = vadd.f32 %v820_v10, %v426_v20 }
 0x248   :  { %v437_v27 = vadd.f32 %v820_v10, %v427_v24  ;;  %v446_v29 = vmul.f32 1.442695, %v436_v26  ;;  %vm440_vm12 = vcmp.gt.f32.partialorder %v436_v26, 0.0 }
 0x24a   :  { %917 = vpow2.f32 %v446_v29  ;;  %v448_v30 = vmul.f32 1.442695, %v437_v27  ;;  %vm441_vm13 = vcmp.gt.f32.partialorder %v437_v27, 0.0  ;;  %v167_v29 = vunpack.c.l.s8.bf16 %v165_v18 }
 0x24c   :  { %v914_v31 = vpop.eup %913  ;;  %919 = vpow2.f32 %v448_v30 }
 0x24d   :  { %v821_v33 = vadd.f32 -1.0, %v914_v31 }
 0x24e   :  { %v916_v34 = vpop.eup %915 }
 0x24f   :  { %v822_v35 = vadd.f32 -1.0, %v916_v34  ;;  %v454_v36 = vsel %vm438_vm10, %v434_v13, %v821_v33 }
 0x251   :  { %v455_v37 = vsel %vm439_vm11, %v435_v16, %v822_v35 }
 0x252   :  { %v458_v38 = vpack.c.bf16 %v455_v37, %v454_v36 }
 0x254   :  { %v918_v39 = vpop.eup %917  ;;  %590 = vmatmul.mubr.bf16.vlgmr.msra.gmra.mrb[16].mxu0 %v458_v38  ;;  %v716_v38 = vlaneseq }
 0x255   :  { %599 = vmatprep.mubr.bf16.mxu0 %v990_v4  ;;  %v823_v40 = vadd.f32 -1.0, %v918_v39 }
 0x256   :  { %v920_v19 = vpop.eup %919  ;;  %v717_v39 = vand.u32 127, %v716_v38 }
 0x257   :  { %v824_v41 = vadd.f32 -1.0, %v920_v19  ;;  %v456_v21 = vsel %vm440_vm12, %v436_v26, %v823_v40  ;;  %v843_v19 = vld [vmem:[%s1183_s7] ss:$0 sm:$0xff]  ;;  %s991_s7 = smov [#allocation6]  }
 0x258   :  { %vm718_vm3 = vcmp.lt.s32.totalorder %v717_v39, 8  ;;  %s750_s22 = sshll.u32 %s991_s7, 4  ;;  %s751_s22 = int_to_ptr.vmem [resolvable:$true] %s750_s22 }
 0x259   :  { %v457_v43 = vsel %vm441_vm13, %v437_v27, %v824_v41  ;;  %v166_v27 = vunpack.c.l.s8.bf16 %v164_v17  ;;  %s953_s23 = scalar_lea.vmem %s751_s22, 256  ;;  %p958_p8 = scmp.lt.s32.totalorder %s751_s22, %s751_s22 }
 0x25a   :  { %v459_v23 = vpack.c.bf16 %v457_v43, %v456_v21  ;;  %p954_p7 = scmp.ne.s32.totalorder %s751_s22, %s953_s23  ;;  %p959_p9 = scmp.lt.s32.totalorder %s953_s23, %s953_s23 }
 0x25b   :  { %v841_v30 = vcombine.low %v166_v27, %v167_v29 }
 0x25c   :  { %600 = vmatmul.mubr.bf16.gmra.mrb[20].mxu0 %v459_v23  ;;  %p960_p10 = por %p959_p9, %p958_p8 }
 0x25e   :  { %p961_p11 = pnand %p960_p10, %p954_p7 }
 0x327   :  { %v591_v44 = vpop.f32.mrb[16].mxu0 }
 0x328   :  { %v593_v25 = vpop.f32.mrb[17].mxu0 }
 0x329   :  { %v614_v28 = vmul.f32 0.2, %v593_v25  ;;  %v595_v32 = vpop.f32.mrb[18].mxu0  ;;  %vm610_vm14 = vcmp.gt.f32.partialorder %v593_v25, 0.0 }
 0x32a   :  { %v597_v42 = vpop.f32.mrb[19].mxu0 }
 0x32b   :  { %vm611_vm15 = vcmp.gt.f32.partialorder %v597_v42, 0.0  ;;  %v615_v45 = vmul.f32 0.2, %v597_v42  ;;  %v618_v46 = vsel %vm610_vm14, %v593_v25, %v614_v28 }
 0x32d   :  { %v619_v47 = vsel %vm611_vm15, %v597_v42, %v615_v45 }
 0x32e   :  { %v622_v4 = vmax.f32 %v618_v46, %v619_v47 }
 0x32f   :  { %v601_v48 = vpop.f32.mrb[20].mxu0 }
 0x330   :  { %v603_v49 = vpop.f32.mrb[21].mxu0 }
 0x331   :  { %v616_v50 = vmul.f32 0.2, %v603_v49  ;;  %v605_v51 = vpop.f32.mrb[22].mxu0  ;;  %vm612_vm1 = vcmp.gt.f32.partialorder %v603_v49, 0.0 }
 0x332   :  { %v607_v52 = vpop.f32.mrb[23].mxu0 }
 0x333   :  { %vm613_vm2 = vcmp.gt.f32.partialorder %v607_v52, 0.0  ;;  %v617_v53 = vmul.f32 0.2, %v607_v52  ;;  %v620_v54 = vsel %vm612_vm1, %v603_v49, %v616_v50 }
 0x335   :  { %v621_v55 = vsel %vm613_vm2, %v607_v52, %v617_v53 }
 0x336   :  { %v623_v56 = vmax.f32 %v620_v54, %v621_v55 }
 0x338   :  { %v624_v57 = vmax.f32 %v622_v4, %v623_v56 }
 0x33a   :  { %v625_v58 = vrot.slane %v624_v57, 4 }
 0x33c   :  { %v626_v59 = vmax.f32 %v624_v57, %v625_v58 }
 0x33e   :  { %v627_v60 = vrot.slane %v626_v59, 2 }
 0x340   :  { %v628_v61 = vmax.f32 %v626_v59, %v627_v60 }
 0x342   :  { %v629_v62 = vrot.slane %v628_v61, 1 }
 0x344   :  { %v630_v63 = vmax.f32 %v628_v61, %v629_v62 }
 0x346   :  { %v634_v0 = vsub.f32 %v621_v55, %v630_v63  ;;  %v631_v1 = vsub.f32 %v618_v46, %v630_v63  ;;  %v632_v2 = vsub.f32 %v619_v47, %v630_v63  ;;  %v633_v3 = vsub.f32 %v620_v54, %v630_v63 }
 0x348   :  { %v641_v5 = vmul.f32 1.442695, %v634_v0  ;;  %v635_v6 = vmul.f32 1.442695, %v631_v1  ;;  %v637_v7 = vmul.f32 1.442695, %v632_v2 }
 0x349   :  { %v639_v8 = vmul.f32 1.442695, %v633_v3 }
 0x34a   :  { %921 = vpow2.f32 %v641_v5 }
 0x34b   :  { %923 = vpow2.f32 %v635_v6 }
 0x34c   :  { %925 = vpow2.f32 %v637_v7 }
 0x34d   :  { %927 = vpow2.f32 %v639_v8 }
 0x354   :  { %v922_v9 = vpop.eup %921 }
 0x355   :  { %v924_v10 = vpop.eup %923  ;;  %v646_v11 = vmul.f32 %v922_v9, %v605_v51 }
 0x356   :  { %v926_v12 = vpop.eup %925  ;;  %v643_v13 = vmul.f32 %v924_v10, %v591_v44 }
 0x357   :  { %v928_v14 = vpop.eup %927  ;;  %v649_v15 = vpack.c.bf16 %v926_v12, %v924_v10  ;;  %v644_v16 = vmul.f32 %v926_v12, %v595_v32 }
 0x358   :  { %v650_v20 = vpack.c.bf16 %v922_v9, %v928_v14  ;;  %v645_v22 = vmul.f32 %v928_v14, %v601_v48 }
 0x359   :  { %659 = vmatprep.subr.bf16.mxu1 %v649_v15  ;;  %v647_v24 = vpack.c.bf16 %v644_v16, %v643_v13 }
 0x35a   :  { %v648_v26 = vpack.c.bf16 %v646_v11, %v645_v22 }
 0x35b   :  { %660 = vmatpush1.bf16.msra.mxu1 %v647_v24 }
 0x35c   :  { %661 = vmatprep.subr.bf16.mxu1 %v650_v20 }
 0x35f   :  { %662 = vmatpush1.bf16.msra.mxu1 %v648_v26 }
 0x362   :  { %842 = vmatmul.mubr.msk.bf16.vlgmr.msra.gmra.mrb[8].mxu1 %vm193_vm0, %v841_v30 }
 0x435   :  { %v693_v31 = vpop.f32.mrb[8].mxu1 }
 0x436   :  { %v695_v33 = vpop.f32.mrb[9].mxu1 }
 0x437   :  { %v702_v34 = vmax.f32 %v695_v33, 1e-16  ;;  %v697_v35 = vpop.f32.mrb[10].mxu1 }
 0x438   :  { %v699_v36 = vpop.f32.mrb[11].mxu1 }
 0x439   :  { %929 = vrcp.f32 %v702_v34  ;;  %v703_v37 = vmax.f32 %v699_v36, 1e-16 }
 0x43b   :  { %931 = vrcp.f32 %v703_v37 }
 0x443   :  { %v930_v40 = vpop.eup %929 }
 0x444   :  { %v706_v41 = vmul.f32 %v930_v40, %v693_v31 }
 0x445   :  { %v932_v21 = vpop.eup %931 }
 0x446   :  { %v714_v43 = vadd.f32 %v843_v19, %v706_v41  ;;  %v707_v23 = vmul.f32 %v932_v21, %v697_v35 }
 0x448   :  { %v719_v44 = vsel %vm718_vm3, %v714_v43, -1e+30  ;;  %v715_v25 = vadd.f32 %v843_v19, %v707_v23 }
 0x449   :  { %721 = vmax.xlane.f32.xlu0 %v719_v44 }
 0x44a   :  { %v720_v28 = vsel %vm718_vm3, %v715_v25, -1e+30 }
 0x44d   :  { %723 = vmax.xlane.f32.xlu0 %v720_v28 }
 0x4d6   :  { %v722_v32 = vpop.xlane.xlu0 %721 }
 0x4d7   :  { %v725_v42 = vsub.f32 %v719_v44, %v722_v32 }
 0x4d9   :  { %v727_v45 = vmul.f32 1.442695, %v725_v42 }
 0x4da   :  { %v724_v46 = vpop.xlane.xlu0 %723 }
 0x4db   :  { %933 = vpow2.f32 %v727_v45  ;;  %v726_v47 = vsub.f32 %v720_v28, %v724_v46 }
 0x4dd   :  { %v729_v4 = vmul.f32 1.442695, %v726_v47 }
 0x4df   :  { %935 = vpow2.f32 %v729_v4 }
 0x4e5   :  { %v934_v48 = vpop.eup %933 }
 0x4e6   :  { %v731_v49 = vsel %vm718_vm3, %v934_v48, 0.0 }
 0x4e7   :  { %733 = vadd.xlane.f32.xlu1 %v731_v49 }
 0x4e9   :  { %v936_v50 = vpop.eup %935 }
 0x4ea   :  { %v732_v51 = vsel %vm718_vm3, %v936_v50, 0.0 }
 0x4eb   :  { %735 = vadd.xlane.f32.xlu1 %v732_v51 }
 0x574   :  { %v734_v52 = vpop.xlane.xlu1 %733 }
 0x575   :  { %937 = vlog2.f32 %v734_v52 }
 0x578   :  { %v736_v53 = vpop.xlane.xlu1 %735 }
 0x579   :  { %939 = vlog2.f32 %v736_v53 }
 0x57f   :  { %v938_v54 = vpop.eup %937 }
 0x580   :  { %v738_v55 = vmul.f32 0.6931472, %v938_v54 }
 0x582   :  { %v741_v56 = vsub.f32 %v725_v42, %v738_v55 }
 0x583   :  { %v940_v57 = vpop.eup %939 }
 0x584   :  { %743 = vst [vmem:[#allocation6] sm:$0xff] %v741_v56  ;;  %v740_v58 = vmul.f32 0.6931472, %v940_v57 }
 0x586   :  { %v742_v59 = vsub.f32 %v726_v47, %v740_v58 }
 0x588   :  { %744 = vst [vmem:[#allocation6 + $0x8] sm:$0xff] %v742_v59 }
 0x589   :  { %964 = shalt.err (!%p961_p11)
}
 0x58a   :  { %s965_s26 = scalar_lea.hbm %s1184_s8, 256 }
 0x58b   :  { %p966_p12 = scmp.ne.s32.totalorder %s1184_s8, %s965_s26  ;;  %p969_p13 = scmp.lt.u32.totalorder %s965_s26, %s1184_s8 }
 0x58d   :  { %p971_p0 = pnand %p969_p13, %p966_p12 }
 0x58f   :  { %974 = shalt.err (!%p971_p0)
}
 0x590   :  { %s992_s9 = smov 128   ;;  %s993_s10 = smov 8  }
 0x591   :  { %756 = dma.vmem_to_hbm [thread:$0]  %s751_s22, 256, %s1184_s8, [#allocation7], %s992_s9, %s992_s9, %s993_s10  }
 0x592   :  { %983 = dma.done.wait [#allocation7], 256  }
 0x593   :  { %984 = vsyncadd [#allocation7], 4294967040 }
 0x594   :  { %760 = vsyncpa [#allocation7], 1 }
 0x595   :  { %761 = vsyncmov [#allocation3] }
 0x598   :  { %s762_s4 = vpop.sfrf %761 }
 0x599   :  { %p844_p1 = scmp.ne.s32.totalorder %s762_s4, 0 }
 0x59b   :  { %766 = shalt.err (%p844_p1)  }
 0x59c   :  { %768 = vsyncmov [#allocation3 + $0x1] }
 0x59f   :  { %s769_s12 = vpop.sfrf %768 }
 0x5a0   :  { %p845_p2 = scmp.ne.s32.totalorder %s769_s12, 0 }
 0x5a2   :  { %773 = shalt.err (%p845_p2)  }

</bundles_post_ra>
